<compile_context>
chip_gen: v6e
topology: v6e:2x2x1
jax: 0.10.0
libtpu: 0.0.40
codegen_flags: <defaults>
</compile_context>

<pallas_src>
import jax
import jax.numpy as jnp
from jax.experimental import pallas as pl
from jax.experimental.pallas import tpu as pltpu


FEAT_IN = 17      # input features
FEAT_OUT = 20     # output features
BLOCK_B = 512     # batch rows per grid step (multiple of 8)


def mlp_bias_kernel(x_ref, w_ref, beff_ref, o_ref):
    # x_ref:    (tb, 17)   batch block
    # w_ref:    (17, 20)   folded weights (W1 @ W2), VMEM-resident across steps
    # beff_ref: (1, 20)    folded bias + batch-sum correction
    # o_ref:    (tb, 20)   output block (= v5 - v5.sum(0) for these rows)
    o_ref[...] = (jnp.dot(x_ref[...], w_ref[...],
                          preferred_element_type=jnp.float32)
                  + beff_ref[...]).astype(o_ref.dtype)


def fold_params(w1, b1, w2, b2):
    """Fold the two linear layers once (constant w.r.t. x)."""
    W = (w1 @ w2).astype(jnp.float32)          # (17, 20)
    b = (b1 @ w2 + b2).astype(jnp.float32)     # (1, 20)
    return W, b


@jax.jit
def model_forward(x, W, b):
    B, F = x.shape
    assert F == FEAT_IN
    x = x.astype(jnp.float32)

    # Fold the batch-sum into the bias (linearity of the affine map):
    #   v5 - sum(v5, 0) = x @ W + (1 - B) * b - sum(x, 0) @ W
    beff = (1.0 - B) * b - jnp.sum(x, axis=0, keepdims=True) @ W   # (1, 20)

    tb = B if B <= BLOCK_B else BLOCK_B        # full batch, or 8-aligned block
    grid = (pl.cdiv(B, tb),)

    return pl.pallas_call(
        mlp_bias_kernel,
        out_shape=jax.ShapeDtypeStruct((B, FEAT_OUT), jnp.float32),
        grid_spec=pltpu.PrefetchScalarGridSpec(
            num_scalar_prefetch=0,
            grid=grid,
            in_specs=[
                pl.BlockSpec((tb, FEAT_IN), lambda i: (i, 0)),        # x block
                pl.BlockSpec((FEAT_IN, FEAT_OUT), lambda i: (0, 0)),  # W (resident)
                pl.BlockSpec((1, FEAT_OUT), lambda i: (0, 0)),        # beff (resident)
            ],
            out_specs=pl.BlockSpec((tb, FEAT_OUT), lambda i: (i, 0)),
        ),
        compiler_params=pltpu.CompilerParams(
            dimension_semantics=("parallel",)),
    )(x, W, beff)


def init_params(key):
    # Deterministic init mimicking nn.Linear's uniform(-1/sqrt(fan_in), 1/sqrt(fan_in)).
    # Weights are stored transposed vs. PyTorch (in, out); same math as nn.Linear.
    k1, k2, k3, k4 = jax.random.split(key, 4)
    bound1 = 1.0 / jnp.sqrt(17.0)
    bound2 = 1.0 / jnp.sqrt(10.0)
    w1 = jax.random.uniform(k1, (17, 10), jnp.float32, -bound1, bound1)
    b1 = jax.random.uniform(k2, (1, 10), jnp.float32, -bound1, bound1)
    w2 = jax.random.uniform(k3, (10, 20), jnp.float32, -bound2, bound2)
    b2 = jax.random.uniform(k4, (1, 20), jnp.float32, -bound2, bound2)
    return w1, b1, w2, b2


if __name__ == "__main__":
    key = jax.random.PRNGKey(0)
    k_x, k_p = jax.random.split(key)
    B = 8
    x = jax.random.normal(k_x, (B, FEAT_IN), jnp.float32)
    w1, b1, w2, b2 = init_params(k_p)

    # Parameter folding happens once, outside the per-call path.
    W, b = fold_params(w1, b1, w2, b2)

    out = model_forward(x, W, b)
    out = jax.block_until_ready(out)

    # Pure-JAX reference (unfused, same semantics as the PyTorch module).
    v5 = (x @ w1 + b1) @ w2 + b2
    ref = v5 - jnp.sum(v5, axis=0)
    assert out.shape == (B, FEAT_OUT)
    assert jnp.allclose(out, ref, atol=1e-4, rtol=1e-4)

    print("KERNEL_OK")
</pallas_src>

<mosaic_0001>
module attributes {stable_mosaic.version = 11 : i64} {
  func.func @mlp_bias_kernel(%arg0: i32, %arg1: memref<8x17xf32, #tpu.memory_space<vmem>>, %arg2: memref<17x20xf32, #tpu.memory_space<vmem>>, %arg3: memref<1x20xf32, #tpu.memory_space<vmem>>, %arg4: memref<8x20xf32, #tpu.memory_space<vmem>>) attributes {dimension_semantics = [#tpu.dimension_semantics<parallel>], iteration_bounds = array<i64: 1>, scalar_prefetch = 0 : i64, scratch_operands = 0 : i64, tpu.core_type = #tpu.core_type<tc>, window_params = [{transform_indices = @transform_0, window_bounds = array<i64: 8, 17>}, {pipeline_mode = #tpu.pipeline_mode<synchronous>, transform_indices = @transform_1, window_bounds = array<i64: 17, 20>}, {pipeline_mode = #tpu.pipeline_mode<synchronous>, transform_indices = @transform_2, window_bounds = array<i64: 1, 20>}, {transform_indices = @transform_3, window_bounds = array<i64: 8, 20>}]} {
    %c0 = arith.constant 0 : index
    %c0_0 = arith.constant 0 : index
    %0 = vector.load %arg1[%c0, %c0_0] : memref<8x17xf32, #tpu.memory_space<vmem>>, vector<8x17xf32>
    %c0_1 = arith.constant 0 : index
    %c0_2 = arith.constant 0 : index
    %1 = vector.load %arg2[%c0_1, %c0_2] : memref<17x20xf32, #tpu.memory_space<vmem>>, vector<17x20xf32>
    %cst = arith.constant dense<0.000000e+00> : vector<8x20xf32>
    %2 = tpu.matmul %0, %1, %cst {dimension_numbers = #tpu.dot_dimension_numbers<[1], [0], [0], [1], [0, 0, 1, 1], [], []>} : vector<8x17xf32>, vector<17x20xf32>, vector<8x20xf32> -> vector<8x20xf32>
    %c0_3 = arith.constant 0 : index
    %c0_4 = arith.constant 0 : index
    %3 = vector.load %arg3[%c0_3, %c0_4] : memref<1x20xf32, #tpu.memory_space<vmem>>, vector<1x20xf32>
    %4 = vector.broadcast %3 : vector<1x20xf32> to vector<8x20xf32>
    %5 = arith.addf %2, %4 : vector<8x20xf32>
    %c0_5 = arith.constant 0 : index
    %c0_6 = arith.constant 0 : index
    %6 = vector.load %arg4[%c0_5, %c0_6] : memref<8x20xf32, #tpu.memory_space<vmem>>, vector<8x20xf32>
    tpu.vector_store %arg4[%c0_5, %c0_6], %5 {strides = array<i32>} : memref<8x20xf32, #tpu.memory_space<vmem>>, vector<8x20xf32>,
    return
  }
  func.func @transform_0(%arg0: i32) -> (i32, i32) {
    %c0_i32 = arith.constant 0 : i32
    %c0_i32_0 = arith.constant 0 : i32
    return %arg0, %c0_i32 : i32, i32
  }
  func.func @transform_1(%arg0: i32) -> (i32, i32) {
    %c0_i32 = arith.constant 0 : i32
    %c0_i32_0 = arith.constant 0 : i32
    %c0_i32_1 = arith.constant 0 : i32
    return %c0_i32, %c0_i32_0 : i32, i32
  }
  func.func @transform_2(%arg0: i32) -> (i32, i32) {
    %c0_i32 = arith.constant 0 : i32
    %c0_i32_0 = arith.constant 0 : i32
    %c0_i32_1 = arith.constant 0 : i32
    return %c0_i32, %c0_i32_0 : i32, i32
  }
  func.func @transform_3(%arg0: i32) -> (i32, i32) {
    %c0_i32 = arith.constant 0 : i32
    %c0_i32_0 = arith.constant 0 : i32
    return %arg0, %c0_i32 : i32, i32
  }
}

</mosaic_0001>

<bundles_post_ra>
// kernel: model_forward.1
= control target key start
LH: loop header
LB: loop body
LE: loop exit
PB: predicated region body
PF: predicated region fallthrough
CT: control target
= control target key end

     0   :  { %vm30_vm0 = vcmask 1040384   ;;  %v161_v1 = vmov 0.0   ;;  %vm162_vm1 = vmmov 0   ;;  %s202_s0 = inlined_call_operand.vmem [shape: f32[8,17], index: 0, kind: input, shape index: {}]   ;;  %s203_s1 = inlined_call_operand.vmem [shape: f32[17,20], index: 1, kind: input, shape index: {}]   ;;  %s204_s2 = inlined_call_operand.vmem [shape: f32[1,20], index: 2, kind: input, shape index: {}]   ;;  %s205_s3 = inlined_call_operand.hbm [shape: f32[8,20], index: 3, kind: output, shape index: {}]  }
   0x1   :  { %v18_v0 = vld [vmem:[%s203_s1 + $0x10] sm:$0x1]  ;;  %127 = vmatprep.subr.mxu0 %v161_v1  ;;  %v17_v2 = vld [vmem:[%s203_s1 + $0x8] sm:$0xff]  ;;  %133 = vmatprep.mubr.msk.f32.mxu0 %vm162_vm1, %v161_v1 }
   0x2   :  { %128 = vmatpush3.msk.msra.mxu0 %vm30_vm0, %v18_v0 }
   0x3   :  { %8 = vsyncpa [#allocation3], 0  ;;  %129 = vmatprep.subr.mxu0 %v161_v1  ;;  %v16_v3 = vld [vmem:[%s203_s1] sm:$0xff]  ;;  %vm26_vm2 = vcmask 138240   ;;  %s163_s22 = smov [#allocation2]   ;;  %vm104_vm3 = vcmask 162816  }
   0x4   :  { %130 = vmatpush3.msra.mxu0 %v17_v2  ;;  %v15_v4 = vld [vmem:[%s202_s0] sm:$0xff]  ;;  %s112_s23 = sshll.u32 %s163_s22, 4  ;;  %s113_s23 = int_to_ptr.vmem [resolvable:$true] %s112_s23 }
   0x5   :  { %131 = vmatprep.subr.mxu0 %v161_v1  ;;  %v120_v5 = vld [vmem:[%s204_s2] ss:$0 sm:$0xff]  ;;  %s139_s1 = scalar_lea.vmem %s113_s23, 128  ;;  %p144_p1 = scmp.lt.s32.totalorder %s113_s23, %s113_s23 }
   0x6   :  { %132 = vmatpush3.msra.mxu0 %v16_v3  ;;  %p140_p0 = scmp.ne.s32.totalorder %s113_s23, %s139_s1  ;;  %p145_p2 = scmp.lt.s32.totalorder %s139_s1, %s139_s1 }
   0x7   :  { %134 = vmatmul.mubr.msk.f32.vlgmr.msra.gmra.mxu0 %vm26_vm2, %v15_v4 }
   0x8   :  { %p146_p3 = por %p145_p2, %p144_p1 }
   0xa   :  { %p147_p4 = pnand %p146_p3, %p140_p0 }
  0xc7   :  { %v100_v6 = vpop.f32.mrf.mxu0 }
  0xc8   :  { %v101_v7 = vadd.f32 %v120_v5, %v100_v6 }
  0xc9   :  { %v135_v8 = vpop.f32.mrf.mxu0 }
  0xca   :  { %105 = vst.msk [vmem:[#allocation2] sm:$0xff] %vm104_vm3, %v101_v7 }
  0xcb   :  { %150 = shalt.err (!%p147_p4)
}
  0xcc   :  { %115 = dma.vmem_to_hbm [thread:$0]  %s113_s23, 128, %s205_s3, [#allocation3]  }
  0xcd   :  { %159 = dma.done.wait [#allocation3], 128  }
  0xce   :  { %160 = vsyncadd [#allocation3], 4294967168 }
  0xcf   :  { %119 = vsyncpa [#allocation3], 1 }

</bundles_post_ra>
